<compile_context>
chip_gen: v7x
topology: tpu7x:2x2x1
jax: 0.10.0
libtpu: 0.0.40
codegen_flags: <defaults>
</compile_context>

<pallas_src>
import functools

import jax
import jax.numpy as jnp
import numpy as np
from jax.experimental import pallas as pl
from jax.experimental.pallas import tpu as pltpu


def _round_up(x, m):
    return (x + m - 1) // m * m


# ---------------------------------------------------------------------------
# Kernel A: fused gather.  Tables are VMEM-resident (constant index_map); the
# gather is a one-hot selection matmul on the MXU, everything lane-dense.
# ---------------------------------------------------------------------------
def _fused_kernel(x_ref, t0_ref, t1_ref, out_ref):
    # x_ref  : (2, TILE_N) int32   row indices into the two tables
    # t0_ref : (F_aug, V0) float32 [factors0 | bias0 | 1].T (zero padded)
    # t1_ref : (F_aug, V1) float32 [factors1 | 1 | bias1].T (zero padded)
    # out_ref: (1, TILE_N) float32
    tile_n = x_ref.shape[1]
    v0 = t0_ref.shape[1]
    v1 = t1_ref.shape[1]

    idx0 = x_ref[0:1, :]                                     # (1, TILE_N)
    idx1 = x_ref[1:2, :]

    # One-hot selection matrices (VPU compares), gathered rows via MXU matmul
    # directly in the transposed, lane-dense (F_aug, TILE_N) layout.
    iota0 = jax.lax.broadcasted_iota(jnp.int32, (v0, tile_n), 0)
    iota1 = jax.lax.broadcasted_iota(jnp.int32, (v1, tile_n), 0)
    oh0 = (iota0 == idx0).astype(jnp.float32)                # (V0, TILE_N)
    oh1 = (iota1 == idx1).astype(jnp.float32)                # (V1, TILE_N)

    g0 = jnp.dot(t0_ref[...], oh0, preferred_element_type=jnp.float32)
    g1 = jnp.dot(t1_ref[...], oh1, preferred_element_type=jnp.float32)

    # Augmented dot == factor dot + bias0 + bias1 (small sublane reduce).
    z = jnp.sum(g0 * g1, axis=0, keepdims=True)              # (1, TILE_N)
    out_ref[...] = 1.2 * jax.nn.sigmoid(z) - 0.1             # EUP + VPU


# ---------------------------------------------------------------------------
# Kernel B: streaming fallback for huge ID tables.  Inputs are pre-gathered
# (XLA) augmented factor columns in the lane-dense (F_aug, TILE_N) layout.
# ---------------------------------------------------------------------------
def _stream_kernel(g0_ref, g1_ref, out_ref):
    z = jnp.sum(g0_ref[...] * g1_ref[...], axis=0, keepdims=True)
    out_ref[...] = 1.2 * jax.nn.sigmoid(z) - 0.1


def collab_filter_forward(X, factors0, factors1, bias0, bias1, *,
                          tile_n=1024, fused_gather_max_ids=2048):
    """X: (N, 2) int32 index pairs.  Returns (N, 1) float32 predictions."""
    num_rows = X.shape[0]
    num_features = factors0.shape[1]
    v0, v1 = factors0.shape[0], factors1.shape[0]

    # Augment tables so the bias add rides inside the feature dot:
    #   [f0 | b0 | 1] . [f1 | 1 | b1] = f0.f1 + b0 + b1
    ones0 = jnp.ones((v0, 1), jnp.float32)
    ones1 = jnp.ones((v1, 1), jnp.float32)
    t0 = jnp.concatenate(
        [factors0.astype(jnp.float32), bias0.astype(jnp.float32), ones0], axis=1)
    t1 = jnp.concatenate(
        [factors1.astype(jnp.float32), ones1, bias1.astype(jnp.float32)], axis=1)
    f_aug = num_features + 2
    f_aug_pad = _round_up(f_aug, 8)                   # clean sublane multiple
    t0 = jnp.pad(t0, ((0, 0), (0, f_aug_pad - f_aug)))
    t1 = jnp.pad(t1, ((0, 0), (0, f_aug_pad - f_aug)))

    idx0 = X[:, 0].astype(jnp.int32)
    idx1 = X[:, 1].astype(jnp.int32)

    # Rows sit on the lane axis -> tile must be a multiple of 128 lanes.
    tile_n = max(128, min(int(tile_n), _round_up(num_rows, 128)))
    tile_n = _round_up(tile_n, 128)
    n_pad = _round_up(num_rows, tile_n)
    grid = (n_pad // tile_n,)

    use_fused = max(v0, v1) <= fused_gather_max_ids

    if use_fused:
        # Keep the (tiny) augmented tables resident in VMEM; stream only the
        # int32 index block and the (1, tile_n) output per grid step.
        v0p = _round_up(v0, 8)
        v1p = _round_up(v1, 8)
        t0_t = jnp.pad(t0, ((0, v0p - v0), (0, 0))).T        # (F_aug, V0p)
        t1_t = jnp.pad(t1, ((0, v1p - v1), (0, 0))).T        # (F_aug, V1p)

        x_t = jnp.stack([idx0, idx1], axis=0)                # (2, N)
        x_t = jnp.pad(x_t, ((0, 0), (0, n_pad - num_rows)))  # padded idx=0 (valid)

        table_bytes = 4 * f_aug_pad * (v0p + v1p)
        block_bytes = 4 * tile_n * (2 + 1)                   # idx block + out block
        vmem_limit = min(96 * 1024 * 1024,
                         max(32 * 1024 * 1024,
                             2 * table_bytes + 4 * block_bytes + (8 << 20)))

        out = pl.pallas_call(
            _fused_kernel,
            out_shape=jax.ShapeDtypeStruct((1, n_pad), jnp.float32),
            grid_spec=pltpu.PrefetchScalarGridSpec(
                num_scalar_prefetch=0,
                grid=grid,
                in_specs=[
                    pl.BlockSpec((2, tile_n), lambda i: (0, i)),
                    pl.BlockSpec((f_aug_pad, v0p), lambda i: (0, 0)),  # resident
                    pl.BlockSpec((f_aug_pad, v1p), lambda i: (0, 0)),  # resident
                ],
                out_specs=pl.BlockSpec((1, tile_n), lambda i: (0, i)),
            ),
            compiler_params=pltpu.CompilerParams(
                dimension_semantics=("parallel",),
                vmem_limit_bytes=int(vmem_limit)),
        )(x_t, t0_t, t1_t)
    else:
        # Tables too large to keep resident / one-hot select: gather with XLA,
        # then stream lane-dense transposed blocks through the kernel.
        g0 = jnp.take(t0, idx0, axis=0)                      # (N, F_aug)
        g1 = jnp.take(t1, idx1, axis=0)
        g0 = jnp.pad(g0, ((0, n_pad - num_rows), (0, 0))).T  # (F_aug, N_pad)
        g1 = jnp.pad(g1, ((0, n_pad - num_rows), (0, 0))).T

        block_bytes = 4 * tile_n * (2 * f_aug_pad + 1)
        vmem_limit = min(96 * 1024 * 1024,
                         max(32 * 1024 * 1024, 4 * block_bytes + (8 << 20)))

        out = pl.pallas_call(
            _stream_kernel,
            out_shape=jax.ShapeDtypeStruct((1, n_pad), jnp.float32),
            grid_spec=pltpu.PrefetchScalarGridSpec(
                num_scalar_prefetch=0,
                grid=grid,
                in_specs=[
                    pl.BlockSpec((f_aug_pad, tile_n), lambda i: (0, i)),
                    pl.BlockSpec((f_aug_pad, tile_n), lambda i: (0, i)),
                ],
                out_specs=pl.BlockSpec((1, tile_n), lambda i: (0, i)),
            ),
            compiler_params=pltpu.CompilerParams(
                dimension_semantics=("parallel",),
                vmem_limit_bytes=int(vmem_limit)),
        )(g0, g1)

    return out[0, :num_rows].reshape(num_rows, 1)


def init_params(key, num_ids, num_features, variance=0.01):
    k0, k1, k2, k3 = jax.random.split(key, 4)
    factors0 = variance * jax.random.normal(k0, (num_ids[0], num_features), jnp.float32)
    factors1 = variance * jax.random.normal(k1, (num_ids[1], num_features), jnp.float32)
    bias0 = variance * jax.random.normal(k2, (num_ids[0], 1), jnp.float32)
    bias1 = variance * jax.random.normal(k3, (num_ids[1], 1), jnp.float32)
    return factors0, factors1, bias0, bias1


def _reference(X, factors0, factors1, bias0, bias1):
    f0 = factors0[X[:, 0]]
    f1 = factors1[X[:, 1]]
    res = jnp.sum(f0 * f1, axis=1, keepdims=True)
    res = res + bias0[X[:, 0]] + bias1[X[:, 1]]
    return 1.2 * jax.nn.sigmoid(res) - 0.1


if __name__ == "__main__":
    num_ids = [12, 10]          # [num customers, num items]
    num_features = 32
    num_rows = 8

    key = jax.random.PRNGKey(0)
    kp, kx0, kx1 = jax.random.split(key, 3)
    factors0, factors1, bias0, bias1 = init_params(kp, num_ids, num_features)

    col0 = jax.random.randint(kx0, (num_rows,), 0, num_ids[0], dtype=jnp.int32)
    col1 = jax.random.randint(kx1, (num_rows,), 0, num_ids[1], dtype=jnp.int32)
    X = jnp.stack([col0, col1], axis=1)                      # (num_rows, 2) int32

    fwd = jax.jit(collab_filter_forward,
                  static_argnames=("tile_n", "fused_gather_max_ids"))

    # Small batch (module-scale), fused-gather path.
    out = jax.block_until_ready(fwd(X, factors0, factors1, bias0, bias1))
    ref = _reference(X, factors0, factors1, bias0, bias1)
    np.testing.assert_allclose(np.asarray(out), np.asarray(ref), rtol=1e-5, atol=1e-6)

    # Larger batch: exercises multi-step grid + row padding (fused path).
    kb0, kb1 = jax.random.split(jax.random.PRNGKey(1))
    big_rows = 1000
    Xb = jnp.stack(
        [jax.random.randint(kb0, (big_rows,), 0, num_ids[0], dtype=jnp.int32),
         jax.random.randint(kb1, (big_rows,), 0, num_ids[1], dtype=jnp.int32)],
        axis=1)
    out_b = jax.block_until_ready(
        fwd(Xb, factors0, factors1, bias0, bias1, tile_n=256))
    ref_b = _reference(Xb, factors0, factors1, bias0, bias1)
    np.testing.assert_allclose(np.asarray(out_b), np.asarray(ref_b), rtol=1e-5, atol=1e-6)

    # Same data through the streamed fallback path (used for huge ID tables).
    out_s = jax.block_until_ready(
        fwd(Xb, factors0, factors1, bias0, bias1, tile_n=256, fused_gather_max_ids=0))
    np.testing.assert_allclose(np.asarray(out_s), np.asarray(ref_b), rtol=1e-5, atol=1e-6)

    print("KERNEL_OK")
</pallas_src>

<mosaic_0001>
module attributes {stable_mosaic.version = 11 : i64} {
  func.func @_fused_kernel(%arg0: i32, %arg1: memref<2x128xi32, #tpu.memory_space<vmem>>, %arg2: memref<40x16xf32, #tpu.memory_space<vmem>>, %arg3: memref<40x16xf32, #tpu.memory_space<vmem>>, %arg4: memref<1x128xf32, #tpu.memory_space<vmem>>) attributes {dimension_semantics = [#tpu.dimension_semantics<parallel>], iteration_bounds = array<i64: 1>, scalar_prefetch = 0 : i64, scratch_operands = 0 : i64, tpu.core_type = #tpu.core_type<tc>, window_params = [{transform_indices = @transform_0, window_bounds = array<i64: 2, 128>}, {pipeline_mode = #tpu.pipeline_mode<synchronous>, transform_indices = @transform_1, window_bounds = array<i64: 40, 16>}, {pipeline_mode = #tpu.pipeline_mode<synchronous>, transform_indices = @transform_2, window_bounds = array<i64: 40, 16>}, {transform_indices = @transform_3, window_bounds = array<i64: 1, 128>}]} {
    %c0 = arith.constant 0 : index
    %c0_0 = arith.constant 0 : index
    %0 = vector.load %arg1[%c0, %c0_0] : memref<2x128xi32, #tpu.memory_space<vmem>>, vector<1x128xi32>
    %c1 = arith.constant 1 : index
    %c0_1 = arith.constant 0 : index
    %1 = vector.load %arg1[%c1, %c0_1] : memref<2x128xi32, #tpu.memory_space<vmem>>, vector<1x128xi32>
    %2 = tpu.iota {dimensions = array<i32: 0>} : vector<16x128xi32>
    %3 = tpu.iota {dimensions = array<i32: 0>} : vector<16x128xi32>
    %4 = vector.broadcast %0 : vector<1x128xi32> to vector<16x128xi32>
    %5 = arith.cmpi eq, %2, %4 : vector<16x128xi32>
    %6 = arith.extui %5 : vector<16x128xi1> to vector<16x128xi32>
    %7 = arith.sitofp %6 : vector<16x128xi32> to vector<16x128xf32>
    %8 = vector.broadcast %1 : vector<1x128xi32> to vector<16x128xi32>
    %9 = arith.cmpi eq, %3, %8 : vector<16x128xi32>
    %10 = arith.extui %9 : vector<16x128xi1> to vector<16x128xi32>
    %11 = arith.sitofp %10 : vector<16x128xi32> to vector<16x128xf32>
    %c0_2 = arith.constant 0 : index
    %c0_3 = arith.constant 0 : index
    %12 = vector.load %arg2[%c0_2, %c0_3] : memref<40x16xf32, #tpu.memory_space<vmem>>, vector<40x16xf32>
    %cst = arith.constant dense<0.000000e+00> : vector<40x128xf32>
    %13 = tpu.matmul %12, %7, %cst {dimension_numbers = #tpu.dot_dimension_numbers<[1], [0], [0], [1], [0, 0, 1, 1], [], []>} : vector<40x16xf32>, vector<16x128xf32>, vector<40x128xf32> -> vector<40x128xf32>
    %c0_4 = arith.constant 0 : index
    %c0_5 = arith.constant 0 : index
    %14 = vector.load %arg3[%c0_4, %c0_5] : memref<40x16xf32, #tpu.memory_space<vmem>>, vector<40x16xf32>
    %cst_6 = arith.constant dense<0.000000e+00> : vector<40x128xf32>
    %15 = tpu.matmul %14, %11, %cst_6 {dimension_numbers = #tpu.dot_dimension_numbers<[1], [0], [0], [1], [0, 0, 1, 1], [], []>} : vector<40x16xf32>, vector<16x128xf32>, vector<40x128xf32> -> vector<40x128xf32>
    %16 = arith.mulf %13, %15 : vector<40x128xf32>
    %cst_7 = arith.constant dense<0.000000e+00> : vector<128xf32>
    %17 = vector.multi_reduction <add>, %16, %cst_7 [0] : vector<40x128xf32> to vector<128xf32>
    %18 = vector.shape_cast %17 : vector<128xf32> to vector<1x128xf32>
    %19 = arith.negf %18 : vector<1x128xf32>
    %20 = math.exp %19 : vector<1x128xf32>
    %cst_8 = arith.constant 1.000000e+00 : f32
    %21 = vector.broadcast %cst_8 : f32 to vector<1x128xf32>
    %22 = arith.addf %21, %20 : vector<1x128xf32>
    %23 = arith.divf %21, %22 : vector<1x128xf32>
    %cst_9 = arith.constant 1.200000e+00 : f32
    %24 = vector.broadcast %cst_9 : f32 to vector<1x128xf32>
    %25 = arith.mulf %24, %23 : vector<1x128xf32>
    %cst_10 = arith.constant 1.000000e-01 : f32
    %26 = vector.broadcast %cst_10 : f32 to vector<1x128xf32>
    %27 = arith.subf %25, %26 : vector<1x128xf32>
    %c0_11 = arith.constant 0 : index
    %c0_12 = arith.constant 0 : index
    %28 = vector.load %arg4[%c0_11, %c0_12] : memref<1x128xf32, #tpu.memory_space<vmem>>, vector<1x128xf32>
    tpu.vector_store %arg4[%c0_11, %c0_12], %27 {strides = array<i32>} : memref<1x128xf32, #tpu.memory_space<vmem>>, vector<1x128xf32>,
    return
  }
  func.func @transform_0(%arg0: i32) -> (i32, i32) {
    %c0_i32 = arith.constant 0 : i32
    %c0_i32_0 = arith.constant 0 : i32
    return %c0_i32, %arg0 : i32, i32
  }
  func.func @transform_1(%arg0: i32) -> (i32, i32) {
    %c0_i32 = arith.constant 0 : i32
    %c0_i32_0 = arith.constant 0 : i32
    %c0_i32_1 = arith.constant 0 : i32
    return %c0_i32, %c0_i32_0 : i32, i32
  }
  func.func @transform_2(%arg0: i32) -> (i32, i32) {
    %c0_i32 = arith.constant 0 : i32
    %c0_i32_0 = arith.constant 0 : i32
    %c0_i32_1 = arith.constant 0 : i32
    return %c0_i32, %c0_i32_0 : i32, i32
  }
  func.func @transform_3(%arg0: i32) -> (i32, i32) {
    %c0_i32 = arith.constant 0 : i32
    %c0_i32_0 = arith.constant 0 : i32
    return %c0_i32, %arg0 : i32, i32
  }
}

</mosaic_0001>

<bundles_post_ra>
// kernel: collab_filter_forward.1
= control target key start
LH: loop header
LB: loop body
LE: loop exit
PB: predicated region body
PF: predicated region fallthrough
CT: control target
= control target key end

     0   :  { %v16_v0 = vlaneseq  ;;  %v376_v1 = vmov 0.0|0.0   ;;  %vm377_vm0 = vmmov 0   ;;  %v378_v5 = vmov 0.0   ;;  %s459_s0 = inlined_call_operand.vmem [shape: s32[2,128], index: 0, kind: input, shape index: {}]   ;;  %s460_s1 = inlined_call_operand.vmem [shape: f32[40,16], index: 1, kind: input, shape index: {}]   ;;  %s461_s2 = inlined_call_operand.vmem [shape: f32[40,16], index: 2, kind: input, shape index: {}]   ;;  %s462_s3 = inlined_call_operand.vmem [shape: f32[1,128], index: 3, kind: output, shape index: {}]  }
   0x1   :  { %362 = vmatprep.subr.bf16.mxu0 %v376_v1  ;;  %365 = vmatprep.subr.bf16.mxu1 %v376_v1  ;;  %v288_v2 = vld [vmem:[%s459_s0] ss:$0 sm:$0xff]  ;;  %v291_v4 = vld [vmem:[%s459_s0 + $0x1] ss:$0 sm:$0xff]  ;;  %v379_v7 = vmov 1.0|1.0  }
   0x2   :  { %v17_v3 = vshrl.u32 %v16_v0, 7  ;;  %328 = vmatprep.mubr.msk.f32.mxu0 %vm377_vm0, %v378_v5  ;;  %347 = vmatprep.mubr.msk.f32.mxu1 %vm377_vm0, %v378_v5  ;;  %v39_v8 = vld [vmem:[%s460_s1] sm:$0xff]  ;;  %vm44_vm7 = vcmask 130048   ;;  %v40_v10 = vld [vmem:[%s460_s1 + $0x8] sm:$0xff]  ;;  %v41_v12 = vld [vmem:[%s460_s1 + $0x10] sm:$0xff] }
   0x3   :  { %v150_v9 = vld [vmem:[%s461_s2] sm:$0xff]  ;;  %v151_v11 = vld [vmem:[%s461_s2 + $0x8] sm:$0xff]  ;;  %v152_v13 = vld [vmem:[%s461_s2 + $0x10] sm:$0xff] }
   0x4   :  { %v18_v6 = vadd.s32 8, %v17_v3  ;;  %vm23_vm1 = vcmp.eq.s32.totalorder %v17_v3, %v288_v2  ;;  %vm33_vm2 = vcmp.eq.s32.totalorder %v17_v3, %v291_v4  ;;  %v42_v14 = vld [vmem:[%s460_s1 + $0x18] sm:$0xff]  ;;  %v43_v16 = vld [vmem:[%s460_s1 + $0x20] sm:$0xff] }
   0x5   :  { %v153_v15 = vld [vmem:[%s461_s2 + $0x18] sm:$0xff]  ;;  %v154_v17 = vld [vmem:[%s461_s2 + $0x20] sm:$0xff] }
   0x6   :  { %vm24_vm3 = vcmp.eq.s32.totalorder %v18_v6, %v288_v2  ;;  %vm34_vm4 = vcmp.eq.s32.totalorder %v18_v6, %v291_v4 }
   0x7   :  { %vm363_vm5 = vmpackc.low %vm24_vm3, %vm23_vm1 }
   0x8   :  { %364 = vmatpush3.bf16.msk.msra.mxu0 %vm363_vm5, %v379_v7  ;;  %vm366_vm6 = vmpackc.low %vm34_vm4, %vm33_vm2 }
   0x9   :  { %367 = vmatpush3.bf16.msk.msra.mxu1 %vm366_vm6, %v379_v7 }
   0xb   :  { %329 = vmatmul.mubr.msk.f32.vlgmr.msra.gmra.mrb[0].mxu0 %vm44_vm7, %v39_v8 }
   0xc   :  { %348 = vmatmul.mubr.msk.f32.vlgmr.msra.gmra.mrb[0].mxu1 %vm44_vm7, %v150_v9  ;;  %331 = vmatprep.mubr.msk.f32.mxu0 %vm377_vm0, %v378_v5 }
   0xd   :  { %350 = vmatprep.mubr.msk.f32.mxu1 %vm377_vm0, %v378_v5 }
   0xf   :  { %332 = vmatmul.mubr.msk.f32.gmra.mrb[2].mxu0 %vm44_vm7, %v40_v10 }
  0x10   :  { %351 = vmatmul.mubr.msk.f32.gmra.mrb[2].mxu1 %vm44_vm7, %v151_v11  ;;  %334 = vmatprep.mubr.msk.f32.mxu0 %vm377_vm0, %v378_v5 }
  0x11   :  { %353 = vmatprep.mubr.msk.f32.mxu1 %vm377_vm0, %v378_v5 }
  0x13   :  { %335 = vmatmul.mubr.msk.f32.gmra.mrb[4].mxu0 %vm44_vm7, %v41_v12 }
  0x14   :  { %354 = vmatmul.mubr.msk.f32.gmra.mrb[4].mxu1 %vm44_vm7, %v152_v13  ;;  %337 = vmatprep.mubr.msk.f32.mxu0 %vm377_vm0, %v378_v5 }
  0x15   :  { %356 = vmatprep.mubr.msk.f32.mxu1 %vm377_vm0, %v378_v5 }
  0x17   :  { %338 = vmatmul.mubr.msk.f32.gmra.mrb[6].mxu0 %vm44_vm7, %v42_v14 }
  0x18   :  { %357 = vmatmul.mubr.msk.f32.gmra.mrb[6].mxu1 %vm44_vm7, %v153_v15  ;;  %340 = vmatprep.mubr.msk.f32.mxu0 %vm377_vm0, %v378_v5 }
  0x19   :  { %359 = vmatprep.mubr.msk.f32.mxu1 %vm377_vm0, %v378_v5 }
  0x1b   :  { %341 = vmatmul.mubr.msk.f32.gmra.mrb[8].mxu0 %vm44_vm7, %v43_v16 }
  0x1c   :  { %360 = vmatmul.mubr.msk.f32.gmra.mrb[8].mxu1 %vm44_vm7, %v154_v17 }
  0xde   :  { %v126_v18 = vpop.f32.mrb[0].mxu0 }
  0xdf   :  { %v236_v19 = vpop.f32.mrb[0].mxu1  ;;  %v330_v20 = vpop.f32.mrb[1].mxu0 }
  0xe0   :  { %v260_v21 = vmul.f32 %v236_v19, %v126_v18  ;;  %v349_v22 = vpop.f32.mrb[1].mxu1 }
  0xe2   :  { %v131_v23 = vpop.f32.mrb[2].mxu0 }
  0xe3   :  { %v241_v24 = vpop.f32.mrb[2].mxu1  ;;  %v333_v25 = vpop.f32.mrb[3].mxu0 }
  0xe4   :  { %v261_v26 = vmul.f32 %v241_v24, %v131_v23  ;;  %v352_v27 = vpop.f32.mrb[3].mxu1 }
  0xe6   :  { %v265_v28 = vadd.f32 %v261_v26, %v260_v21  ;;  %v136_v29 = vpop.f32.mrb[4].mxu0 }
  0xe7   :  { %v246_v30 = vpop.f32.mrb[4].mxu1  ;;  %v336_v31 = vpop.f32.mrb[5].mxu0 }
  0xe8   :  { %v262_v32 = vmul.f32 %v246_v30, %v136_v29  ;;  %v355_v33 = vpop.f32.mrb[5].mxu1 }
  0xea   :  { %v266_v34 = vadd.f32 %v265_v28, %v262_v32  ;;  %v141_v35 = vpop.f32.mrb[6].mxu0 }
  0xeb   :  { %v251_v36 = vpop.f32.mrb[6].mxu1  ;;  %v339_v37 = vpop.f32.mrb[7].mxu0 }
  0xec   :  { %v263_v38 = vmul.f32 %v251_v36, %v141_v35  ;;  %v358_v39 = vpop.f32.mrb[7].mxu1 }
  0xee   :  { %v267_v40 = vadd.f32 %v266_v34, %v263_v38  ;;  %v146_v41 = vpop.f32.mrb[8].mxu0 }
  0xef   :  { %v256_v42 = vpop.f32.mrb[8].mxu1  ;;  %v342_v43 = vpop.f32.mrb[9].mxu0 }
  0xf0   :  { %v264_v44 = vmul.f32 %v256_v42, %v146_v41  ;;  %v361_v45 = vpop.f32.mrb[9].mxu1 }
  0xf2   :  { %v268_v46 = vadd.f32 %v267_v40, %v264_v44 }
  0xf4   :  { %v269_v47 = vrot.slane %v268_v46, 4 }
  0xf6   :  { %v270_v48 = vadd.f32 %v269_v47, %v268_v46 }
  0xf8   :  { %v271_v49 = vrot.slane %v270_v48, 2 }
  0xfa   :  { %v272_v50 = vadd.f32 %v271_v49, %v270_v48 }
  0xfc   :  { %v273_v51 = vrot.slane %v272_v50, 1 }
  0xfe   :  { %v274_v52 = vadd.f32 %v273_v51, %v272_v50 }
 0x100   :  { %v308_v53 = vmul.f32 -1.442695, %v274_v52 }
 0x102   :  { %372 = vpow2.f32 %v308_v53 }
 0x10c   :  { %v373_v54 = vpop.eup %372 }
 0x10d   :  { %v278_v55 = vadd.f32 1.0, %v373_v54 }
 0x10f   :  { %374 = vrcp.f32 %v278_v55 }
 0x119   :  { %v375_v56 = vpop.eup %374 }
 0x11a   :  { %v281_v57 = vmul.f32 1.2, %v375_v56 }
 0x11c   :  { %v309_v58 = vadd.f32 -0.1, %v281_v57 }
 0x11e   :  { %283 = vst [vmem:[%s462_s3] sm:$0x1] %v309_v58 }

</bundles_post_ra>
